<compile_context>
chip_gen: v5e
topology: v5e:2x2
jax: 0.10.0
libtpu: 0.0.40
codegen_flags: <defaults>
</compile_context>

<pallas_src>
import functools

import numpy as np
import jax
import jax.numpy as jnp
from jax import lax
from jax.experimental import pallas as pl
from jax.experimental.pallas import tpu as pltpu


def _round_up(x, m):
    return (x + m - 1) // m * m


# ----------------------------- Pallas kernel ---------------------------------
def _ou_bridge_kernel(x_ref,                       # (TILE_M, F)       bf16
                      w1_ref, b1_ref,              # (F, D1_pad) bf16, (1, D1_pad) f32
                      w2_ref, b2_ref,              # (D1_pad, D2_pad) bf16, (1, D2_pad) f32
                      tail_ref,                    # (TILE_M, D2_pad) bf16  tail[token]
                      srat_ref,                    # (TILE_M, 1) f32        ratio[l]
                      rw_ref,                      # (TILE_M, 1) f32        inv2var[l] (0 on pad rows)
                      mid_ref,                     # out: (TILE_M, D2_pad) bf16
                      loss_ref,                    # out: (1, 8, D2_pad) f32 partial sums
                      *, tile_m, d2_pad):
    # Linear 1 (bf16 on the MXU, f32 accumulate) -> tanh-GELU (EUP, not VPU erf poly)
    h = jnp.dot(x_ref[...], w1_ref[...],
                preferred_element_type=jnp.float32) + b1_ref[...]
    c0 = np.float32(0.7978845608028654)            # sqrt(2/pi)
    c1 = np.float32(0.044715)
    h = 0.5 * h * (1.0 + jnp.tanh(c0 * (h + c1 * h * h * h)))

    # Linear 2 (f32 accumulator kept for the residual / loss math)
    mid = jnp.dot(h.astype(jnp.bfloat16), w2_ref[...],
                  preferred_element_type=jnp.float32) + b2_ref[...]
    mid_ref[...] = mid.astype(jnp.bfloat16)        # lane-dense bf16 writeback

    # OU-bridge residual:  mid - ratio[l] * tail[n]
    resid = mid - srat_ref[...] * tail_ref[...].astype(jnp.float32)
    wsq = (resid * resid) * rw_ref[...]            # per-row inv2var weight, 0 on padding

    # Fold rows into an (8, D2_pad) partial with pure vreg adds (no XLU reduce,
    # no masked scalar store); final reduction happens in the wrapper.
    loss_ref[0] = jnp.sum(wsq.reshape(tile_m // 8, 8, d2_pad), axis=0)


def ou_bridge_pallas(x, w1, b1, w2, b2, tail, srat, rw, *, tile_m, tiles_per_layer):
    """x: [L1*N_pad, F] bf16.  Returns (mid [L1*N_pad, D2_pad] bf16, loss partials)."""
    m_total, f_dim = x.shape
    d1_pad = w1.shape[1]
    d2_pad = w2.shape[1]
    num_tiles = m_total // tile_m                  # = L1 * tiles_per_layer

    kernel = functools.partial(_ou_bridge_kernel, tile_m=tile_m, d2_pad=d2_pad)

    if tiles_per_layer == 1:
        tail_map = lambda i: (0, 0)                # constant -> tail stays VMEM-resident
    else:
        tail_map = lambda i: (i % tiles_per_layer, 0)   # re-fetched once per layer

    mid, partials = pl.pallas_call(
        kernel,
        grid=(num_tiles,),
        in_specs=[
            pl.BlockSpec((tile_m, f_dim), lambda i: (i, 0)),      # x (streamed, bf16, no K-pad)
            pl.BlockSpec((f_dim, d1_pad), lambda i: (0, 0)),      # w1 (resident)
            pl.BlockSpec((1, d1_pad), lambda i: (0, 0)),          # b1
            pl.BlockSpec((d1_pad, d2_pad), lambda i: (0, 0)),     # w2 (resident)
            pl.BlockSpec((1, d2_pad), lambda i: (0, 0)),          # b2
            pl.BlockSpec((tile_m, d2_pad), tail_map),             # tail (bf16, per-token)
            pl.BlockSpec((tile_m, 1), lambda i: (i, 0)),          # ratio per row
            pl.BlockSpec((tile_m, 1), lambda i: (i, 0)),          # inv2var per row (0 on pad)
        ],
        out_specs=(
            pl.BlockSpec((tile_m, d2_pad), lambda i: (i, 0)),     # mid_states (bf16)
            pl.BlockSpec((1, 8, d2_pad), lambda i: (i, 0, 0)),    # per-tile loss partials
        ),
        out_shape=(
            jax.ShapeDtypeStruct((m_total, d2_pad), jnp.bfloat16),
            jax.ShapeDtypeStruct((num_tiles, 8, d2_pad), jnp.float32),
        ),
        compiler_params=pltpu.CompilerParams(
            dimension_semantics=("parallel",)),                   # >= L1 tiles -> both TCs on v7x
    )(x, w1, b1, w2, b2, tail, srat, rw)
    return mid, partials


# ----------------------------- Glue (plain JAX) -------------------------------
def ou_bridge_forward(params, hidden_states, labels, attention_mask,
                      ignore_index=-100):
    """Mirrors OUBridgeWithLinear.forward.

    hidden_states: [L+1, B, S, H] float32
    labels:        [B, S] int32
    attention_mask:[B, S] float32
    """
    L1, B, S, H = hidden_states.shape  # L1 = layer_num + 1

    am = attention_mask.astype(jnp.float32)
    hs = hidden_states.astype(jnp.float32)

    # context: attention-weighted mean over the sequence axis -> [L1, B, H]
    # (clamped denominator only matters for a fully-masked row, where torch
    #  would produce NaN anyway)
    denom = jnp.maximum(am.sum(axis=-1, keepdims=True), 1e-9)
    ctx = (hs * am[None, :, :, None]).sum(axis=2) / denom[None]

    # data-dependent token selection (torch masked_select), row-major order.
    # TODO(synk): production code should bucket n_tokens to fixed sizes to avoid
    # the host sync / per-shape recompiles; padding to TILE_M already buckets M.
    mask_np = np.asarray(labels) != ignore_index          # [B, S]
    b_idx, s_idx = np.nonzero(mask_np)
    n_tokens = int(b_idx.shape[0])
    assert n_tokens > 0

    sel_hidden = hs[:, b_idx, s_idx, :]                   # [L1, N, H]
    ctx_exp = ctx[:, b_idx, :]                            # [L1, N, H]
    x = jnp.concatenate([ctx_exp, sel_hidden], axis=-1)   # [L1, N, 2H]

    true_labels = np.asarray(labels)[b_idx, s_idx]        # [N]
    tail = params["tail_embedding"][jnp.asarray(true_labels)]   # [N, D2]

    # OU bridge time schedule (layer_num = L1 - 1)
    layer_index = jnp.arange(1, L1 + 1, dtype=jnp.float32)      # 1 .. L+1
    t = layer_index / jnp.float32(L1 + 1)                       # / (layer_num + 2)
    T_sinh = jnp.sinh(jnp.float32(1.0))
    t_sinh = jnp.sinh(t)
    diff_sinh = jnp.sinh(1.0 - t)
    var = diff_sinh * t_sinh / T_sinh
    ratio = (t_sinh / T_sinh).astype(jnp.float32)               # [L1]
    inv2var = (1.0 / (2.0 * var)).astype(jnp.float32)           # [L1]

    # ---- fold the layer axis into the matmul M dim; per-layer token tiling ----
    F = 2 * H                                            # K of matmul-1, left unpadded
    D1 = params["w1"].shape[1]
    D2 = params["w2"].shape[1]
    D1_pad = _round_up(D1, 128)
    D2_pad = _round_up(D2, 128)

    # tile_m rows per grid step, all within one layer; cap bounds the padding waste.
    tile_m = min(1024, _round_up(n_tokens, 8))
    N_pad = _round_up(n_tokens, tile_m)
    tiles_per_layer = N_pad // tile_m
    M = L1 * N_pad                                       # fused rows, layer-major

    x_p = jnp.pad(x, ((0, 0), (0, N_pad - n_tokens), (0, 0)))
    x_p = x_p.astype(jnp.bfloat16).reshape(M, F)

    w1p = jnp.pad(params["w1"], ((0, 0), (0, D1_pad - D1))).astype(jnp.bfloat16)
    b1p = jnp.pad(params["b1"], ((0, 0), (0, D1_pad - D1))).astype(jnp.float32)
    w2p = jnp.pad(params["w2"], ((0, D1_pad - D1), (0, D2_pad - D2))).astype(jnp.bfloat16)
    b2p = jnp.pad(params["b2"], ((0, 0), (0, D2_pad - D2))).astype(jnp.float32)

    # per-token tail (bf16, streamed once / resident) + tiny per-row scalar streams
    tail_p = jnp.pad(tail, ((0, N_pad - n_tokens), (0, D2_pad - D2))).astype(jnp.bfloat16)

    srat = jnp.broadcast_to(ratio[:, None], (L1, N_pad)).reshape(M, 1).astype(jnp.float32)
    valid = (jnp.arange(N_pad) < n_tokens).astype(jnp.float32)        # [N_pad]
    rw = (inv2var[:, None] * valid[None, :]).reshape(M, 1).astype(jnp.float32)

    mid_pad, partials = ou_bridge_pallas(
        x_p, w1p, b1p, w2p, b2p, tail_p, srat, rw,
        tile_m=tile_m, tiles_per_layer=tiles_per_layer)

    loss = jnp.sum(partials) / jnp.float32(L1 * n_tokens)   # mean over (L+1)*N tokens
    mid_states = mid_pad.reshape(L1, N_pad, D2_pad)[:, :n_tokens, :D2].astype(jnp.float32)
    return loss, mid_states


def reference_forward(params, x, tail, ratio, inv2var):
    """Pure-JAX f32 reference of the module math (exact erf-GELU)."""
    h = x @ params["w1"] + params["b1"]
    h = 0.5 * h * (1.0 + lax.erf(h / np.sqrt(2.0)))
    mid = h @ params["w2"] + params["b2"]
    resid = mid - ratio[:, None, None] * tail[None]
    per = (resid * resid).sum(-1) * inv2var[:, None]
    return per.mean(), mid


# ----------------------------------- main -------------------------------------
if __name__ == "__main__":
    # model config
    H = 32                  # hidden_dim
    PROJECT_DIM = [64, 32]  # -> mid_project: Linear(64,64) -> GELU -> Linear(64,32)
    D1, D2 = PROJECT_DIM
    VOCAB = 50
    IGNORE = -100

    # data config
    L1 = 5                  # layer_num + 1
    B, S = 2, 8

    key = jax.random.PRNGKey(0)
    k_hs, k_lab, k_w1, k_b1, k_w2, k_b2, k_emb = jax.random.split(key, 7)

    hidden_states = jax.random.normal(k_hs, (L1, B, S, H), dtype=jnp.float32)
    labels = jax.random.randint(k_lab, (B, S), 0, VOCAB, dtype=jnp.int32)
    labels = labels.at[:, :2].set(IGNORE)                 # some ignored positions
    attention_mask = jnp.ones((B, S), dtype=jnp.float32)
    attention_mask = attention_mask.at[1, -1].set(0.0)

    # deterministic parameter init (torch.nn.Linear-style uniform bounds)
    lim1 = 1.0 / np.sqrt(2 * H)
    lim2 = 1.0 / np.sqrt(D1)
    params = {
        "w1": jax.random.uniform(k_w1, (2 * H, D1), jnp.float32, -lim1, lim1),
        "b1": jax.random.uniform(k_b1, (1, D1), jnp.float32, -lim1, lim1),
        "w2": jax.random.uniform(k_w2, (D1, D2), jnp.float32, -lim2, lim2),
        "b2": jax.random.uniform(k_b2, (1, D2), jnp.float32, -lim2, lim2),
    }
    # TODO(synk): original tail_embedding uses sklearn PCA of the token embedding;
    # replaced with a deterministic random matrix, row-normalized like the module.
    emb = jax.random.normal(k_emb, (VOCAB, D2), dtype=jnp.float32)
    params["tail_embedding"] = emb / jnp.linalg.norm(emb, axis=-1, keepdims=True)

    loss, mid_states = ou_bridge_forward(params, hidden_states, labels,
                                         attention_mask, ignore_index=IGNORE)
    jax.block_until_ready((loss, mid_states))

    # sanity check against a pure-JAX f32 reference of the same math
    mask_np = np.asarray(labels) != IGNORE
    b_idx, s_idx = np.nonzero(mask_np)
    am = attention_mask
    ctx = (hidden_states * am[None, :, :, None]).sum(2) / am.sum(-1, keepdims=True)[None]
    x_ref = jnp.concatenate([ctx[:, b_idx, :], hidden_states[:, b_idx, s_idx, :]], -1)
    tail_ref = params["tail_embedding"][jnp.asarray(np.asarray(labels)[b_idx, s_idx])]
    li = jnp.arange(1, L1 + 1, dtype=jnp.float32)
    t = li / (L1 + 1)
    ratio = jnp.sinh(t) / jnp.sinh(1.0)
    inv2var = 1.0 / (2.0 * jnp.sinh(1.0 - t) * jnp.sinh(t) / jnp.sinh(1.0))
    loss_r, mid_r = reference_forward(params, x_ref, tail_ref, ratio, inv2var)

    assert np.allclose(np.asarray(mid_states), np.asarray(mid_r), rtol=5e-2, atol=5e-2)
    assert np.allclose(float(loss), float(loss_r), rtol=5e-2, atol=5e-2)

    print("KERNEL_OK")
</pallas_src>

<mosaic_0001>
module attributes {stable_mosaic.version = 11 : i64} {
  func.func @_ou_bridge_kernel(%arg0: i32, %arg1: memref<16x64xbf16, #tpu.memory_space<vmem>>, %arg2: memref<64x128xbf16, #tpu.memory_space<vmem>>, %arg3: memref<1x128xf32, #tpu.memory_space<vmem>>, %arg4: memref<128x128xbf16, #tpu.memory_space<vmem>>, %arg5: memref<1x128xf32, #tpu.memory_space<vmem>>, %arg6: memref<16x128xbf16, #tpu.memory_space<vmem>>, %arg7: memref<16x1xf32, #tpu.memory_space<vmem>>, %arg8: memref<16x1xf32, #tpu.memory_space<vmem>>, %arg9: memref<16x128xbf16, #tpu.memory_space<vmem>>, %arg10: memref<1x8x128xf32, #tpu.memory_space<vmem>>) attributes {dimension_semantics = [#tpu.dimension_semantics<parallel>], iteration_bounds = array<i64: 5>, scalar_prefetch = 0 : i64, scratch_operands = 0 : i64, tpu.core_type = #tpu.core_type<tc>, window_params = [{transform_indices = @transform_0, window_bounds = array<i64: 16, 64>}, {pipeline_mode = #tpu.pipeline_mode<synchronous>, transform_indices = @transform_1, window_bounds = array<i64: 64, 128>}, {pipeline_mode = #tpu.pipeline_mode<synchronous>, transform_indices = @transform_2, window_bounds = array<i64: 1, 128>}, {pipeline_mode = #tpu.pipeline_mode<synchronous>, transform_indices = @transform_3, window_bounds = array<i64: 128, 128>}, {pipeline_mode = #tpu.pipeline_mode<synchronous>, transform_indices = @transform_4, window_bounds = array<i64: 1, 128>}, {pipeline_mode = #tpu.pipeline_mode<synchronous>, transform_indices = @transform_5, window_bounds = array<i64: 16, 128>}, {transform_indices = @transform_6, window_bounds = array<i64: 16, 1>}, {transform_indices = @transform_7, window_bounds = array<i64: 16, 1>}, {transform_indices = @transform_8, window_bounds = array<i64: 16, 128>}, {transform_indices = @transform_9, window_bounds = array<i64: 1, 8, 128>}]} {
    %c0 = arith.constant 0 : index
    %c0_0 = arith.constant 0 : index
    %0 = vector.load %arg1[%c0, %c0_0] : memref<16x64xbf16, #tpu.memory_space<vmem>>, vector<16x64xbf16>
    %c0_1 = arith.constant 0 : index
    %c0_2 = arith.constant 0 : index
    %1 = vector.load %arg2[%c0_1, %c0_2] : memref<64x128xbf16, #tpu.memory_space<vmem>>, vector<64x128xbf16>
    %cst = arith.constant dense<0.000000e+00> : vector<16x128xf32>
    %2 = tpu.matmul %0, %1, %cst {dimension_numbers = #tpu.dot_dimension_numbers<[1], [0], [0], [1], [0, 0, 1, 1], [], []>} : vector<16x64xbf16>, vector<64x128xbf16>, vector<16x128xf32> -> vector<16x128xf32>
    %c0_3 = arith.constant 0 : index
    %c0_4 = arith.constant 0 : index
    %3 = vector.load %arg3[%c0_3, %c0_4] : memref<1x128xf32, #tpu.memory_space<vmem>>, vector<1x128xf32>
    %4 = vector.broadcast %3 : vector<1x128xf32> to vector<16x128xf32>
    %5 = arith.addf %2, %4 : vector<16x128xf32>
    %cst_5 = arith.constant 5.000000e-01 : f32
    %6 = vector.broadcast %cst_5 : f32 to vector<16x128xf32>
    %7 = arith.mulf %6, %5 : vector<16x128xf32>
    %cst_6 = arith.constant 4.471500e-02 : f32
    %8 = vector.broadcast %cst_6 : f32 to vector<16x128xf32>
    %9 = arith.mulf %8, %5 : vector<16x128xf32>
    %10 = arith.mulf %9, %5 : vector<16x128xf32>
    %11 = arith.mulf %10, %5 : vector<16x128xf32>
    %12 = arith.addf %5, %11 : vector<16x128xf32>
    %cst_7 = arith.constant 0.797884583 : f32
    %13 = vector.broadcast %cst_7 : f32 to vector<16x128xf32>
    %14 = arith.mulf %13, %12 : vector<16x128xf32>
    %15 = math.tanh %14 : vector<16x128xf32>
    %cst_8 = arith.constant 1.000000e+00 : f32
    %16 = vector.broadcast %cst_8 : f32 to vector<16x128xf32>
    %17 = arith.addf %16, %15 : vector<16x128xf32>
    %18 = arith.mulf %7, %17 : vector<16x128xf32>
    %19 = arith.truncf %18 : vector<16x128xf32> to vector<16x128xbf16>
    %c0_9 = arith.constant 0 : index
    %c0_10 = arith.constant 0 : index
    %20 = vector.load %arg4[%c0_9, %c0_10] : memref<128x128xbf16, #tpu.memory_space<vmem>>, vector<128x128xbf16>
    %cst_11 = arith.constant dense<0.000000e+00> : vector<16x128xf32>
    %21 = tpu.matmul %19, %20, %cst_11 {dimension_numbers = #tpu.dot_dimension_numbers<[1], [0], [0], [1], [0, 0, 1, 1], [], []>} : vector<16x128xbf16>, vector<128x128xbf16>, vector<16x128xf32> -> vector<16x128xf32>
    %c0_12 = arith.constant 0 : index
    %c0_13 = arith.constant 0 : index
    %22 = vector.load %arg5[%c0_12, %c0_13] : memref<1x128xf32, #tpu.memory_space<vmem>>, vector<1x128xf32>
    %23 = vector.broadcast %22 : vector<1x128xf32> to vector<16x128xf32>
    %24 = arith.addf %21, %23 : vector<16x128xf32>
    %25 = arith.truncf %24 : vector<16x128xf32> to vector<16x128xbf16>
    %c0_14 = arith.constant 0 : index
    %c0_15 = arith.constant 0 : index
    %26 = vector.load %arg9[%c0_14, %c0_15] : memref<16x128xbf16, #tpu.memory_space<vmem>>, vector<16x128xbf16>
    tpu.vector_store %arg9[%c0_14, %c0_15], %25 {strides = array<i32>} : memref<16x128xbf16, #tpu.memory_space<vmem>>, vector<16x128xbf16>,
    %c0_16 = arith.constant 0 : index
    %c0_17 = arith.constant 0 : index
    %27 = vector.load %arg7[%c0_16, %c0_17] : memref<16x1xf32, #tpu.memory_space<vmem>>, vector<16x1xf32>
    %c0_18 = arith.constant 0 : index
    %c0_19 = arith.constant 0 : index
    %28 = vector.load %arg6[%c0_18, %c0_19] : memref<16x128xbf16, #tpu.memory_space<vmem>>, vector<16x128xbf16>
    %29 = arith.extf %28 : vector<16x128xbf16> to vector<16x128xf32>
    %30 = vector.broadcast %27 : vector<16x1xf32> to vector<16x128xf32>
    %31 = arith.mulf %30, %29 : vector<16x128xf32>
    %32 = arith.subf %24, %31 : vector<16x128xf32>
    %33 = arith.mulf %32, %32 : vector<16x128xf32>
    %c0_20 = arith.constant 0 : index
    %c0_21 = arith.constant 0 : index
    %34 = vector.load %arg8[%c0_20, %c0_21] : memref<16x1xf32, #tpu.memory_space<vmem>>, vector<16x1xf32>
    %35 = vector.broadcast %34 : vector<16x1xf32> to vector<16x128xf32>
    %36 = arith.mulf %33, %35 : vector<16x128xf32>
    %37 = vector.shape_cast %36 : vector<16x128xf32> to vector<2x8x128xf32>
    %cst_22 = arith.constant dense<0.000000e+00> : vector<8x128xf32>
    %38 = vector.multi_reduction <add>, %37, %cst_22 [0] : vector<2x8x128xf32> to vector<8x128xf32>
    %c0_23 = arith.constant 0 : index
    %c0_24 = arith.constant 0 : index
    %c0_25 = arith.constant 0 : index
    %39 = vector.load %arg10[%c0_23, %c0_24, %c0_25] : memref<1x8x128xf32, #tpu.memory_space<vmem>>, vector<1x8x128xf32>
    %40 = vector.shape_cast %39 : vector<1x8x128xf32> to vector<8x128xf32>
    %41 = vector.shape_cast %38 : vector<8x128xf32> to vector<1x8x128xf32>
    tpu.vector_store %arg10[%c0_23, %c0_24, %c0_25], %41 {strides = array<i32>} : memref<1x8x128xf32, #tpu.memory_space<vmem>>, vector<1x8x128xf32>,
    return
  }
  func.func @transform_0(%arg0: i32) -> (i32, i32) {
    %c0_i32 = arith.constant 0 : i32
    %c0_i32_0 = arith.constant 0 : i32
    return %arg0, %c0_i32 : i32, i32
  }
  func.func @transform_1(%arg0: i32) -> (i32, i32) {
    %c0_i32 = arith.constant 0 : i32
    %c0_i32_0 = arith.constant 0 : i32
    %c0_i32_1 = arith.constant 0 : i32
    return %c0_i32, %c0_i32_0 : i32, i32
  }
  func.func @transform_2(%arg0: i32) -> (i32, i32) {
    %c0_i32 = arith.constant 0 : i32
    %c0_i32_0 = arith.constant 0 : i32
    %c0_i32_1 = arith.constant 0 : i32
    return %c0_i32, %c0_i32_0 : i32, i32
  }
  func.func @transform_3(%arg0: i32) -> (i32, i32) {
    %c0_i32 = arith.constant 0 : i32
    %c0_i32_0 = arith.constant 0 : i32
    %c0_i32_1 = arith.constant 0 : i32
    return %c0_i32, %c0_i32_0 : i32, i32
  }
  func.func @transform_4(%arg0: i32) -> (i32, i32) {
    %c0_i32 = arith.constant 0 : i32
    %c0_i32_0 = arith.constant 0 : i32
    %c0_i32_1 = arith.constant 0 : i32
    return %c0_i32, %c0_i32_0 : i32, i32
  }
  func.func @transform_5(%arg0: i32) -> (i32, i32) {
    %c0_i32 = arith.constant 0 : i32
    %c0_i32_0 = arith.constant 0 : i32
    %c0_i32_1 = arith.constant 0 : i32
    return %c0_i32, %c0_i32_0 : i32, i32
  }
  func.func @transform_6(%arg0: i32) -> (i32, i32) {
    %c0_i32 = arith.constant 0 : i32
    %c0_i32_0 = arith.constant 0 : i32
    return %arg0, %c0_i32 : i32, i32
  }
  func.func @transform_7(%arg0: i32) -> (i32, i32) {
    %c0_i32 = arith.constant 0 : i32
    %c0_i32_0 = arith.constant 0 : i32
    return %arg0, %c0_i32 : i32, i32
  }
  func.func @transform_8(%arg0: i32) -> (i32, i32) {
    %c0_i32 = arith.constant 0 : i32
    %c0_i32_0 = arith.constant 0 : i32
    return %arg0, %c0_i32 : i32, i32
  }
  func.func @transform_9(%arg0: i32) -> (i32, i32, i32) {
    %c0_i32 = arith.constant 0 : i32
    %c0_i32_0 = arith.constant 0 : i32
    %c0_i32_1 = arith.constant 0 : i32
    return %arg0, %c0_i32, %c0_i32_0 : i32, i32, i32
  }
}

</mosaic_0001>

<bundles_post_ra>
// kernel: tpu_custom_call.1
= control target key start
LH: loop header
LB: loop body
LE: loop exit
PB: predicated region body
PF: predicated region fallthrough
CT: control target
= control target key end

     0   :  { %s1210_s0 = inlined_call_operand.vmem [shape: bf16[80,64], index: 0, kind: input, shape index: {}]   ;;  %s1211_s1 = inlined_call_operand.vmem [shape: bf16[64,128], index: 1, kind: input, shape index: {}]   ;;  %s1212_s2 = inlined_call_operand.vmem [shape: f32[1,128], index: 2, kind: input, shape index: {}]   ;;  %s1213_s3 = inlined_call_operand.vmem [shape: bf16[128,128], index: 3, kind: input, shape index: {}]   ;;  %s1214_s4 = inlined_call_operand.vmem [shape: f32[1,128], index: 4, kind: input, shape index: {}]   ;;  %s1215_s5 = inlined_call_operand.vmem [shape: bf16[16,128], index: 5, kind: input, shape index: {}]   ;;  %s1216_s6 = inlined_call_operand.vmem [shape: f32[80,1], index: 6, kind: input, shape index: {}]   ;;  %s1217_s7 = inlined_call_operand.vmem [shape: f32[80,1], index: 7, kind: input, shape index: {}]   ;;  %s1218_s8 = inlined_call_operand.hbm [shape: bf16[80,128], index: 8, kind: output, shape index: {0}]   ;;  %s1219_s9 = inlined_call_operand.hbm [shape: f32[5,8,128], index: 9, kind: output, shape index: {1}]  }
   0x1   :  { %1220 = sst [smem:[#allocation8_spill]] %s1210_s0 }
   0x2   :  { %1221 = sst [smem:[#allocation9_spill]] %s1211_s1 }
   0x3   :  { %1222 = sst [smem:[#allocation10_spill]] %s1212_s2 }
   0x4   :  { %1223 = sst [smem:[#allocation11_spill]] %s1213_s3 }
   0x5   :  { %15 = vsyncpa [#allocation3], 0 }
   0x6   :  { %17 = vsyncpa [#allocation3 + $0x1], 0 }
   0x7   :  { %18 = vsyncpa [#allocation5], 0 }
   0x8   :  { %20 = vsyncpa [#allocation5 + $0x1], 0  ;;  %s1047_s30 = smov 0   ;;  %s1049_s10 = smov 0  }
   0x9   :  { %s1051_s11 = smov 0   ;;  %s1053_s12 = smov 0  }
   0xa LB: > { %s1068_s13 = sadd.s32 4294967295, %s992_s12   ;;  %s748_s14 = sadd.s32 4294967294, %s992_s12   ;;  %s992_s12 = sphi %s1053_s12, %s1233_s12   ;;  %s988_s11 = sphi %s1051_s11, %s1232_s11   ;;  %s984_s10 = sphi %s1049_s10, %s1231_s10   ;;  %s980_s30 = sphi %s1047_s30, %s1230_s30  }
   0xb   : > { %s1072_s15 = sadd.s32 1, %s992_s12   ;;  %s216_s16 = sadd.s32 1, %s988_s11 }
   0xc   : > { %s213_s17 = ssub.s32 %s992_s12, %s1072_s15  ;;  %p226_p0 = scmp.ne.s32.totalorder %s988_s11, %s984_s10 }
   0xd   : > { %p214_p1 = scmp.eq.s32.totalorder %s213_s17, 0  ;;  %p227_p2 = scmp.eq.s32.totalorder %s1068_s13, 4 }
   0xe   : > { %p232_p3 = scmp.ne.s32.totalorder %s984_s10, %s980_s30  ;;  %p233_p4 = scmp.eq.s32.totalorder %s748_s14, 4 }
   0xf   : > { %s1083_s18 = scalar_select %p214_p1, %s988_s11, %s216_s16  }
  0x10   : > { %p1085_p5 = por %p227_p2, %p226_p0  ;;  %p1089_p6 = por %p233_p4, %p232_p3 }
  0x11   : > { %p751_p7 = scmp.ge.s32.totalorder %s992_s12, 1  ;;  %p319_p8 = scmp.lt.s32.totalorder %s992_s12, 6 }
  0x13   : > { %p320_p9 = pnand %p751_p7, %p319_p8 }
  0x14   : > { %s1226_s1 = sld [smem:[#allocation9_spill]] (!%p320_p9)  ;;  %s754_s23 = sshll.u32 (!%p320_p9), %s1068_s13, 1 }
  0x15   : > { %323 = sbr.rel (%p320_p9) target bundleno = 355 (0x163), region = 52  ;;  %p371_p10 = scmp.lt.s32.totalorder (!%p320_p9), %s754_s23, 9 }
  0x16   : > { %s1227_s0 = sld [smem:[#allocation8_spill]] (!%p320_p9)  ;;  %s1155_s27 = sand.u32 (!%p320_p9), 1, %s984_s10  }
  0x17   : > { %s1228_s3 = sld [smem:[#allocation11_spill]] (!%p320_p9)  ;;  %s595_s16 = scalar_lea.sflag (!%p320_p9), [#allocation3], %s1155_s27 }
  0x18   : > { %s1229_s2 = sld [smem:[#allocation10_spill]] (!%p320_p9) }
  0x1a   : > { %v824_v0 = vld [vmem:[%s1226_s1 + $0x18] sm:$0xff]  ;;  %v823_v1 = vld [vmem:[%s1226_s1 + $0x10] sm:$0xff]  ;;  %s1235_s23 = smov (!%p371_p10, %s754_s23), 9  ;;  %v822_v2 = vld [vmem:[%s1226_s1 + $0x8] sm:$0xff]  ;;  %vm433_vm0 = vcmask 523264   ;;  %v994_v19 = vmov 0  }
  0x1b   : > { %441 = vmatpush.bf16.msra.mxu0 %v824_v0  ;;  %s755_s28 = sshll.u32 %s1235_s23, 2  ;;  %v821_v3 = vld [vmem:[%s1226_s1] sm:$0xff]  ;;  %s757_s29 = sshll.u32 %s1235_s23, 3  ;;  %890 = vset.pattern.permute.xlu0 %v994_v19 }
  0x1c   : > { %s374_s21 = scalar_lea.vmem %s1227_s0, %s755_s28  ;;  %s386_s24 = scalar_lea.vmem %s1217_s7, %s757_s29  ;;  %891 = vset.pattern.permute.xlu1 %v994_v19  ;;  %v840_v42 = vld [vmem:[%s1215_s5] sm:$0xff]  }
  0x1d   : > { %v820_v4 = vld [vmem:[%s374_s21] sm:$0xff]  ;;  %v832_v5 = vld [vmem:[%s1228_s3 + $0x38] sm:$0xff]  ;;  %v831_v6 = vld [vmem:[%s1228_s3 + $0x30] sm:$0xff]  ;;  %s380_s21 = scalar_lea.vmem %s1216_s6, %s757_s29  ;;  %v841_v44 = vunpack.c.l.bf16 %v840_v42  ;;  %s752_s29 = sshll.u32 %s1155_s27, 3  ;;  %v842_v50 = vunpack.c.h.bf16 %v840_v42 }
  0x1e   : > { %538 = vmatpush.bf16.msra.mxu1 %v832_v5  ;;  %v830_v7 = vld [vmem:[%s1228_s3 + $0x28] sm:$0xff]  ;;  %v829_v8 = vld [vmem:[%s1228_s3 + $0x20] sm:$0xff]  ;;  %v828_v9 = vld [vmem:[%s1228_s3 + $0x18] sm:$0xff]  ;;  %s833_s28 = sshll.u32 %s1068_s13, 3  ;;  %s369_s25 = scalar_lea.vmem [#allocation4], %s752_s29 }
  0x1f   : > { %442 = vmatpush.bf16.msra.mxu0 %v823_v1  ;;  %v827_v10 = vld [vmem:[%s1228_s3 + $0x10] sm:$0xff]  ;;  %v826_v11 = vld [vmem:[%s1228_s3 + $0x8] sm:$0xff]  ;;  %v825_v12 = vld [vmem:[%s1228_s3] sm:$0xff]  ;;  %s611_s17 = scalar_lea.hbm %s1218_s8, %s833_s28  ;;  %s1167_s23 = scalar_lea.hbm %s1219_s9, %s833_s28 }
  0x20   : > { %v892_v13 = vld [vmem:[%s1229_s2] ss:$0 sm:$0xff]  ;;  %v557_v25 = vld [vmem:[%s380_s21 + $0x8] sm:$0xff]  ;;  %s629_s26 = sshll.u32 %s369_s25, 4  ;;  %s631_s14 = sshll.u32 %s1167_s23, 4  ;;  %s630_s26 = int_to_ptr.vmem [resolvable:$true] %s629_s26  ;;  %s632_s14 = int_to_ptr.hbm [resolvable:$true] %s631_s14 }
  0x21   : > { %v556_v16 = vld [vmem:[%s380_s21] sm:$0xff]  ;;  %v579_v26 = vld [vmem:[%s386_s24 + $0x8] sm:$0xff]  ;;  %s362_s21 = scalar_lea.vmem [#allocation2], %s752_s29  ;;  %s918_s0 = scalar_lea.hbm %s1218_s8, 40 }
  0x22   : > { %539 = vmatpush.bf16.msra.mxu1 %v831_v6  ;;  %v578_v17 = vld [vmem:[%s386_s24] sm:$0xff]  ;;  %564 = vperm.xlu0 %890, %v556_v16   ;;  %s612_s22 = sshll.u32 %s362_s21, 4  ;;  %s614_s24 = sshll.u32 %s611_s17, 4  ;;  %s1162_s22 = int_to_ptr.vmem [resolvable:$true] %s612_s22  ;;  %s615_s24 = int_to_ptr.hbm [resolvable:$true] %s614_s24 }
  0x23   : > { %443 = vmatpush.bf16.msra.mxu0 %v822_v2  ;;  %582 = vperm.xlu1 %891, %v578_v17   ;;  %v893_v45 = vld [vmem:[%s1214_s4] ss:$0 sm:$0xff]  ;;  %s912_s17 = sshra.s32 %s615_s24, 4  ;;  %s913_s17 = int_to_ptr.hbm [resolvable:$true] %s912_s17 }
  0x24   : > { %s914_s1 = scalar_lea.hbm %s913_s17, 8  ;;  %p919_p0 = scmp.lt.s32.totalorder %s913_s17, %s1218_s8 }
  0x25   : > { %p915_p11 = scmp.ne.s32.totalorder %s913_s17, %s914_s1  ;;  %p920_p1 = scmp.lt.s32.totalorder %s918_s0, %s914_s1 }
  0x26   : > { %540 = vmatpush.bf16.msra.mxu1 %v830_v7 }
  0x27   : > { %444 = vmatpush.bf16.msra.mxu0 %v821_v3  ;;  %p916_p12 = pnand %p915_p11, %p1085_p5  ;;  %p921_p2 = por %p920_p1, %p919_p0 }
  0x29   : > { %p917_p13 = pneg %p916_p12 }
  0x2a   : > { %780 = vmatmul.msk.bf16.vlgmr.msra.gmra.mxu0 %vm433_vm0, %v820_v4  ;;  %541 = vmatpush.bf16.msra.mxu1 %v829_v8 }
  0x2b   : > { %569 = vperm.xlu0 %890, %v557_v25   ;;  %587 = vperm.xlu1 %891, %v579_v26   ;;  %p922_p3 = pnand %p921_p2, %p917_p13 }
  0x2e   : > { %542 = vmatpush.bf16.msra.mxu1 %v828_v9 }
  0x32   : > { %543 = vmatpush.bf16.msra.mxu1 %v827_v10 }
  0x36   : > { %544 = vmatpush.bf16.msra.mxu1 %v826_v11 }
  0x3a   : > { %545 = vmatpush.bf16.msra.mxu1 %v825_v12 }
  0x94   : > { %v565_v43 = vpop.permute.xlu0 %564 }
  0x95   : > { %v572_v47 = vmul.f32 %v841_v44, %v565_v43  ;;  %v583_v49 = vpop.permute.xlu1 %582 }
  0x9d   : > { %v570_v51 = vpop.permute.xlu0 %569  ;;  %v588_v60 = vpop.permute.xlu1 %587 }
  0x9e   : > { %v573_v54 = vmul.f32 %v842_v50, %v570_v51 }
  0xa7   : > { %v446_v14 = vpop.f32.mrf.mxu0 }
  0xa8   : > { %v447_v15 = vadd.f32 %v892_v13, %v446_v14 }
  0xaa   : > { %v453_v18 = vmul.f32 0.044715, %v447_v15  ;;  %v451_v36 = vmul.f32 0.5, %v447_v15 }
  0xac   : > { %v455_v20 = vmul.f32 %v453_v18, %v447_v15 }
  0xae   : > { %v457_v21 = vmul.f32 %v455_v20, %v447_v15 }
  0xaf   : > { %v448_v22 = vpop.f32.mrf.mxu0 }
  0xb0   : > { %v449_v23 = vadd.f32 %v892_v13, %v448_v22  ;;  %v459_v24 = vadd.f32 %v457_v21, %v447_v15 }
  0xb2   : > { %v454_v27 = vmul.f32 0.044715, %v449_v23  ;;  %v461_v29 = vmul.f32 0.7978846, %v459_v24  ;;  %v452_v37 = vmul.f32 0.5, %v449_v23 }
  0xb4   : > { %v456_v28 = vmul.f32 %v454_v27, %v449_v23  ;;  %894 = vtanh.f32 %v461_v29 }
  0xb6   : > { %v458_v30 = vmul.f32 %v456_v28, %v449_v23 }
  0xb8   : > { %v460_v31 = vadd.f32 %v458_v30, %v449_v23 }
  0xba   : > { %v462_v32 = vmul.f32 0.7978846, %v460_v31  ;;  %v895_v33 = vpop.eup %894 }
  0xbb   : > { %v465_v34 = vadd.f32 1.0, %v895_v33 }
  0xbc   : > { %896 = vtanh.f32 %v462_v32 }
  0xbd   : > { %v467_v39 = vmul.f32 %v465_v34, %v451_v36 }
  0xc2   : > { %v897_v35 = vpop.eup %896 }
  0xc3   : > { %v466_v38 = vadd.f32 1.0, %v897_v35 }
  0xc5   : > { %v468_v40 = vmul.f32 %v466_v38, %v452_v37 }
  0xc7   : > { %v469_v41 = vpack.c.bf16 %v468_v40, %v467_v39 }
  0xc9   : > { %546 = vmatmul.bf16.vlgmr.msra.gmra.mxu1 %v469_v41 }
 0x146   : > { %v547_v46 = vpop.f32.mrf.mxu1 }
 0x147   : > { %v548_v48 = vadd.f32 %v893_v45, %v547_v46 }
 0x149   : > { %v574_v52 = vsub.f32 %v548_v48, %v572_v47 }
 0x14b   : > { %v576_v56 = vmul.f32 %v574_v52, %v574_v52 }
 0x14e   : > { %v549_v53 = vpop.f32.mrf.mxu1 }
 0x14f   : > { %v550_v55 = vadd.f32 %v893_v45, %v549_v53 }
 0x151   : > { %v837_v57 = vpack.c.bf16 %v550_v55, %v548_v48  ;;  %v575_v58 = vsub.f32 %v550_v55, %v573_v54 }
 0x153   : > { %838 = vst [vmem:[%s362_s21] sm:$0xff] %v837_v57   ;;  %v577_v59 = vmul.f32 %v575_v58, %v575_v58 }
 0x154   : > { %925 = shalt.err (!%p922_p3)
}
 0x155   : > { %s995_s29 = smov 64   ;;  %s996_s21 = smov 4   ;;  %v590_v61 = vmul.f32 %v583_v49, %v576_v56  ;;  %v591_v62 = vmul.f32 %v588_v60, %v577_v59 }
 0x156   : > { %843 = dma.vmem_to_hbm [thread:$0]  (%p1085_p5), %s1162_s22, 128, %s615_s24, %s595_s16, %s995_s29, %s995_s29, %s996_s21  }
 0x157   : > { %v592_v63 = vadd.f32 %v591_v62, %v590_v61  ;;  %s600_s2 = scalar_lea.sflag [#allocation5], %s1155_s27  ;;  %s940_s3 = sshra.s32 %s632_s14, 4  ;;  %s941_s3 = int_to_ptr.hbm [resolvable:$true] %s940_s3 }
 0x158   : > { %s942_s1 = scalar_lea.hbm %s941_s3, 8  ;;  %s946_s28 = scalar_lea.hbm %s1219_s9, 40 }
 0x159   : > { %593 = vst [vmem:[%s369_s25] sm:$0xff] %v592_v63  ;;  %p943_p4 = scmp.ne.s32.totalorder %s941_s3, %s942_s1  ;;  %p947_p9 = scmp.lt.s32.totalorder %s941_s3, %s1219_s9 }
 0x15a   : > { %p948_p10 = scmp.lt.s32.totalorder %s946_s28, %s942_s1 }
 0x15b   : > { %p944_p7 = pnand %p943_p4, %p1085_p5 }
 0x15c   : > { %p949_p11 = por %p948_p10, %p947_p9 }
 0x15d   : > { %p945_p8 = pneg %p944_p7 }
 0x15f   : > { %p950_p12 = pnand %p949_p11, %p945_p8 }
 0x161   : > { %953 = shalt.err (!%p950_p12)
}
 0x162   : > { %844 = dma.vmem_to_hbm [thread:$0]  (%p1085_p5), %s630_s26, 128, %s632_s14, %s600_s2  }
 0x163 PF: > { %p854_p13 = scmp.ge.s32.totalorder %s992_s12, 2  ;;  %s643_s27 = sand.u32 1, %s980_s30  }
 0x164   : > { %s644_s24 = scalar_lea.sflag [#allocation3], %s643_s27 }
 0x165   : > { %p848_p0 = pnand %p854_p13, %p1089_p6 }
 0x167   : > { %p849_p1 = pneg %p848_p0 }
 0x169   : > { %971 = dma.done.wait (%p849_p1), %s644_s24, 128  }
 0x16a   : > { %973 = vsyncadd (%p849_p1), %s644_s24, 4294967168  ;;  %s654_s25 = scalar_lea.sflag [#allocation5], %s643_s27 }
 0x16b   : > { %975 = dma.done.wait (%p849_p1), %s654_s25, 128  }
 0x16c   : > { %977 = vsyncadd (%p849_p1), %s654_s25, 4294967168  ;;  %p23_p5 = scmp.ge.s32.totalorder %s1072_s15, 7   ;;  %s1230_s30 = smov %s984_s10 }
 0x16d   : > { %s1231_s10 = smov %s988_s11  ;;  %s1232_s11 = smov %s1083_s18 }
 0x16e   : > { %s1233_s12 = smov %s1072_s15  ;;  %25 = sbr.rel (!%p23_p5) target bundleno = 10 (0xa), region = 110 }
 0x173   :  { %660 = vsyncpa [#allocation3], 1 }
 0x174   :  { %662 = vsyncpa [#allocation3 + $0x1], 1 }
 0x175   :  { %663 = vsyncpa [#allocation5], 1 }
 0x176   :  { %665 = vsyncpa [#allocation5 + $0x1], 1 }

</bundles_post_ra>
